<compile_context>
chip_gen: v7x
topology: tpu7x:2x2x1
jax: 0.10.0
libtpu: 0.0.40
codegen_flags: <defaults>
</compile_context>

<pallas_src>
import jax
import jax.numpy as jnp
from jax import lax
from jax.experimental import pallas as pl
from jax.experimental.pallas import tpu as pltpu


def neural_plda_kernel(x1_ref, x2_ref, w1_ref, b1_ref, w2_ref, b2_ref,
                       p_ref, q_ref, s_ref):
    """One batch tile: shared embed pass for [x1; x2], then fused PLDA score.

    x1_ref/x2_ref : (TILE_B, D_xvec)   batch tile of each trial side
    w1_ref        : (D_lda, D_xvec)    PyTorch (out, in) layout, VMEM-resident
    w2_ref        : (D_plda, D_lda)
    b1/b2/p/q     : (1, D)             parameter rows, VMEM-resident
    s_ref         : (1, TILE_B)        lane-dense scores for this tile
    """
    tb = x1_ref.shape[0]

    # Single MXU chain for both sides: concat along the sublane (row) axis.
    x = jnp.concatenate([x1_ref[...], x2_ref[...]], axis=0)        # (2*TB, Dx)

    # Linear 1 (centering_and_LDA): x @ W1^T + b1 — contract last dims so the
    # PyTorch (out, in) weight layout is used directly.
    h = lax.dot_general(x, w1_ref[...], (((1,), (1,)), ((), ())),
                        preferred_element_type=jnp.float32) + b1_ref[...]

    # F.normalize: h / max(||h||_2, 1e-12)  ==  h * rsqrt(max(||h||^2, 1e-24))
    sumsq = jnp.sum(h * h, axis=1, keepdims=True)
    h = h * lax.rsqrt(jnp.maximum(sumsq, 1e-24))

    # Linear 2 (centering_and_wccn_plda)
    e = lax.dot_general(h, w2_ref[...], (((1,), (1,)), ((), ())),
                        preferred_element_type=jnp.float32) + b2_ref[...]

    e1 = e[:tb]
    e2 = e[tb:]
    P = p_ref[...] * p_ref[...]          # P = P_sqrt ** 2
    Q = q_ref[...]

    # Fused score terms: one reduction instead of three.
    t = e1 * Q * e1 + e2 * Q * e2 + 2.0 * (e1 * P) * e2            # (TB, Dp)

    # Reduce the feature axis on the MXU so scores land lane-dense (1, TB),
    # avoiding a (TB, 1) masked-store output.
    ones_row = jnp.ones((1, t.shape[1]), jnp.float32)
    s_ref[...] = lax.dot_general(ones_row, t, (((1,), (1,)), ((), ())),
                                 preferred_element_type=jnp.float32)


def neural_plda_forward(x1, x2, w1, b1, w2, b2, p_sqrt, q, tile_b=None):
    """x1, x2: (B, xvector_dim).  w1: (lda, xvec), w2: (plda, lda) [torch layout]."""
    B, d_xvec = x1.shape
    d_lda = w1.shape[0]
    d_plda = w2.shape[0]

    if tile_b is None:
        # Lane-dense tiles (multiple of 128).  Capped at 512 so the
        # double-buffered batch tiles stay small even on v7x's 64 MiB VMEM.
        tile_b = min(512, ((B + 127) // 128) * 128)
    assert tile_b % 128 == 0

    num_tiles = pl.cdiv(B, tile_b)
    b_pad = num_tiles * tile_b
    if b_pad != B:
        x1 = jnp.pad(x1, ((0, b_pad - B), (0, 0)))
        x2 = jnp.pad(x2, ((0, b_pad - B), (0, 0)))

    # Lift 1-D params to (1, D) rows; weights are passed in PyTorch layout.
    b1r = b1.reshape(1, d_lda)
    b2r = b2.reshape(1, d_plda)
    pr = p_sqrt.reshape(1, d_plda)
    qr = q.reshape(1, d_plda)

    resident = lambda shape: pl.BlockSpec(shape, lambda i: (0, 0))

    flops = 4 * b_pad * (d_xvec * d_lda + d_lda * d_plda) + 12 * b_pad * d_plda
    bytes_accessed = 4 * (2 * b_pad * d_xvec            # x1, x2 tiles
                          + d_lda * d_xvec + d_plda * d_lda
                          + d_lda + 3 * d_plda          # b1, b2, P_sqrt, Q
                          + b_pad)                      # scores

    scores = pl.pallas_call(
        neural_plda_kernel,
        out_shape=jax.ShapeDtypeStruct((1, b_pad), jnp.float32),
        grid=(num_tiles,),
        in_specs=[
            pl.BlockSpec((tile_b, d_xvec), lambda i: (i, 0)),   # x1 tile
            pl.BlockSpec((tile_b, d_xvec), lambda i: (i, 0)),   # x2 tile
            resident((d_lda, d_xvec)),                          # W1
            resident((1, d_lda)),                               # b1
            resident((d_plda, d_lda)),                          # W2
            resident((1, d_plda)),                              # b2
            resident((1, d_plda)),                              # P_sqrt
            resident((1, d_plda)),                              # Q
        ],
        out_specs=pl.BlockSpec((1, tile_b), lambda i: (0, i)),  # lane-dense
        compiler_params=pltpu.CompilerParams(
            dimension_semantics=("parallel",),
            vmem_limit_bytes=64 * 1024 * 1024),
        cost_estimate=pl.CostEstimate(
            flops=flops,
            transcendentals=2 * b_pad,
            bytes_accessed=bytes_accessed),
    )(x1, x2, w1, b1r, w2, b2r, pr, qr)

    return scores[0, :B]                                        # (B,)


def reference_forward(x1, x2, w1, b1, w2, b2, p_sqrt, q):
    def embed(x):
        h = x @ w1.T + b1
        nrm = jnp.sqrt(jnp.sum(h * h, axis=1, keepdims=True))
        h = h / jnp.maximum(nrm, 1e-12)
        return h @ w2.T + b2
    e1, e2 = embed(x1), embed(x2)
    P = p_sqrt * p_sqrt
    return (jnp.sum(e1 * q * e1, axis=1)
            + jnp.sum(e2 * q * e2, axis=1)
            + 2.0 * jnp.sum(e1 * P * e2, axis=1))


if __name__ == "__main__":
    # Small shapes consistent with the module's __init__:
    #   xvector_dim=128, layer1_LDA_dim=128, layer2_PLDA_spkfactor_dim=128, batch=8
    B, D_XVEC, D_LDA, D_PLDA = 8, 128, 128, 128

    key = jax.random.PRNGKey(0)
    k = jax.random.split(key, 8)

    x1 = jax.random.normal(k[0], (B, D_XVEC), jnp.float32)
    x2 = jax.random.normal(k[1], (B, D_XVEC), jnp.float32)

    # Deterministic synthetic parameters (uniform init, like torch.rand / Linear init).
    w1 = jax.random.uniform(k[2], (D_LDA, D_XVEC), jnp.float32, -0.1, 0.1)
    b1 = jax.random.uniform(k[3], (D_LDA,), jnp.float32, -0.1, 0.1)
    w2 = jax.random.uniform(k[4], (D_PLDA, D_LDA), jnp.float32, -0.1, 0.1)
    b2 = jax.random.uniform(k[5], (D_PLDA,), jnp.float32, -0.1, 0.1)
    p_sqrt = jax.random.uniform(k[6], (D_PLDA,), jnp.float32)
    q = jax.random.uniform(k[7], (D_PLDA,), jnp.float32)

    s = neural_plda_forward(x1, x2, w1, b1, w2, b2, p_sqrt, q)
    jax.block_until_ready(s)

    s_ref = reference_forward(x1, x2, w1, b1, w2, b2, p_sqrt, q)
    assert s.shape == (B,)
    assert jnp.allclose(s, s_ref, rtol=1e-4, atol=1e-4)

    # TODO(synk): loss helpers (softcdet/crossentropy/cdet/minc) and Kaldi
    # parameter loading are host-side / not part of forward(); not kernelized.
    print("KERNEL_OK")
</pallas_src>

<mosaic_0001>
module attributes {stable_mosaic.version = 11 : i64} {
  func.func @neural_plda_kernel(%arg0: i32, %arg1: memref<128x128xf32, #tpu.memory_space<vmem>>, %arg2: memref<128x128xf32, #tpu.memory_space<vmem>>, %arg3: memref<128x128xf32, #tpu.memory_space<vmem>>, %arg4: memref<1x128xf32, #tpu.memory_space<vmem>>, %arg5: memref<128x128xf32, #tpu.memory_space<vmem>>, %arg6: memref<1x128xf32, #tpu.memory_space<vmem>>, %arg7: memref<1x128xf32, #tpu.memory_space<vmem>>, %arg8: memref<1x128xf32, #tpu.memory_space<vmem>>, %arg9: memref<1x128xf32, #tpu.memory_space<vmem>>) attributes {dimension_semantics = [#tpu.dimension_semantics<parallel>], iteration_bounds = array<i64: 1>, scalar_prefetch = 0 : i64, scratch_operands = 0 : i64, tpu.core_type = #tpu.core_type<tc>, window_params = [{transform_indices = @transform_0, window_bounds = array<i64: 128, 128>}, {transform_indices = @transform_1, window_bounds = array<i64: 128, 128>}, {pipeline_mode = #tpu.pipeline_mode<synchronous>, transform_indices = @transform_2, window_bounds = array<i64: 128, 128>}, {pipeline_mode = #tpu.pipeline_mode<synchronous>, transform_indices = @transform_3, window_bounds = array<i64: 1, 128>}, {pipeline_mode = #tpu.pipeline_mode<synchronous>, transform_indices = @transform_4, window_bounds = array<i64: 128, 128>}, {pipeline_mode = #tpu.pipeline_mode<synchronous>, transform_indices = @transform_5, window_bounds = array<i64: 1, 128>}, {pipeline_mode = #tpu.pipeline_mode<synchronous>, transform_indices = @transform_6, window_bounds = array<i64: 1, 128>}, {pipeline_mode = #tpu.pipeline_mode<synchronous>, transform_indices = @transform_7, window_bounds = array<i64: 1, 128>}, {transform_indices = @transform_8, window_bounds = array<i64: 1, 128>}]} {
    %c0 = arith.constant 0 : index
    %c0_0 = arith.constant 0 : index
    %0 = vector.load %arg1[%c0, %c0_0] : memref<128x128xf32, #tpu.memory_space<vmem>>, vector<128x128xf32>
    %c0_1 = arith.constant 0 : index
    %c0_2 = arith.constant 0 : index
    %1 = vector.load %arg2[%c0_1, %c0_2] : memref<128x128xf32, #tpu.memory_space<vmem>>, vector<128x128xf32>
    %2 = tpu.concatenate %0, %1 in 0 : vector<128x128xf32>, vector<128x128xf32> -> vector<256x128xf32>
    %c0_3 = arith.constant 0 : index
    %c0_4 = arith.constant 0 : index
    %3 = vector.load %arg3[%c0_3, %c0_4] : memref<128x128xf32, #tpu.memory_space<vmem>>, vector<128x128xf32>
    %cst = arith.constant dense<0.000000e+00> : vector<256x128xf32>
    %4 = tpu.matmul %2, %3, %cst {dimension_numbers = #tpu.dot_dimension_numbers<[1], [1], [0], [0], [0, 0, 1, 0], [], []>} : vector<256x128xf32>, vector<128x128xf32>, vector<256x128xf32> -> vector<256x128xf32>
    %c0_5 = arith.constant 0 : index
    %c0_6 = arith.constant 0 : index
    %5 = vector.load %arg4[%c0_5, %c0_6] : memref<1x128xf32, #tpu.memory_space<vmem>>, vector<1x128xf32>
    %6 = vector.broadcast %5 : vector<1x128xf32> to vector<256x128xf32>
    %7 = arith.addf %4, %6 : vector<256x128xf32>
    %8 = arith.mulf %7, %7 : vector<256x128xf32>
    %cst_7 = arith.constant dense<0.000000e+00> : vector<256xf32>
    %9 = vector.multi_reduction <add>, %8, %cst_7 [1] : vector<256x128xf32> to vector<256xf32>
    %10 = vector.shape_cast %9 : vector<256xf32> to vector<256x1xf32>
    %cst_8 = arith.constant 1.000000e-24 : f32
    %11 = vector.broadcast %cst_8 : f32 to vector<256x1xf32>
    %12 = arith.maximumf %10, %11 : vector<256x1xf32>
    %13 = math.rsqrt %12 : vector<256x1xf32>
    %14 = vector.broadcast %13 : vector<256x1xf32> to vector<256x128xf32>
    %15 = arith.mulf %7, %14 : vector<256x128xf32>
    %c0_9 = arith.constant 0 : index
    %c0_10 = arith.constant 0 : index
    %16 = vector.load %arg5[%c0_9, %c0_10] : memref<128x128xf32, #tpu.memory_space<vmem>>, vector<128x128xf32>
    %cst_11 = arith.constant dense<0.000000e+00> : vector<256x128xf32>
    %17 = tpu.matmul %15, %16, %cst_11 {dimension_numbers = #tpu.dot_dimension_numbers<[1], [1], [0], [0], [0, 0, 1, 0], [], []>} : vector<256x128xf32>, vector<128x128xf32>, vector<256x128xf32> -> vector<256x128xf32>
    %c0_12 = arith.constant 0 : index
    %c0_13 = arith.constant 0 : index
    %18 = vector.load %arg6[%c0_12, %c0_13] : memref<1x128xf32, #tpu.memory_space<vmem>>, vector<1x128xf32>
    %19 = vector.broadcast %18 : vector<1x128xf32> to vector<256x128xf32>
    %20 = arith.addf %17, %19 : vector<256x128xf32>
    %21 = vector.extract_strided_slice %20 {offsets = [0, 0], sizes = [128, 128], strides = [1, 1]} : vector<256x128xf32> to vector<128x128xf32>
    %22 = vector.extract_strided_slice %20 {offsets = [128, 0], sizes = [128, 128], strides = [1, 1]} : vector<256x128xf32> to vector<128x128xf32>
    %c0_14 = arith.constant 0 : index
    %c0_15 = arith.constant 0 : index
    %23 = vector.load %arg7[%c0_14, %c0_15] : memref<1x128xf32, #tpu.memory_space<vmem>>, vector<1x128xf32>
    %c0_16 = arith.constant 0 : index
    %c0_17 = arith.constant 0 : index
    %24 = vector.load %arg7[%c0_16, %c0_17] : memref<1x128xf32, #tpu.memory_space<vmem>>, vector<1x128xf32>
    %25 = arith.mulf %23, %24 : vector<1x128xf32>
    %c0_18 = arith.constant 0 : index
    %c0_19 = arith.constant 0 : index
    %26 = vector.load %arg8[%c0_18, %c0_19] : memref<1x128xf32, #tpu.memory_space<vmem>>, vector<1x128xf32>
    %27 = vector.broadcast %26 : vector<1x128xf32> to vector<128x128xf32>
    %28 = arith.mulf %21, %27 : vector<128x128xf32>
    %29 = arith.mulf %28, %21 : vector<128x128xf32>
    %30 = vector.broadcast %26 : vector<1x128xf32> to vector<128x128xf32>
    %31 = arith.mulf %22, %30 : vector<128x128xf32>
    %32 = arith.mulf %31, %22 : vector<128x128xf32>
    %33 = arith.addf %29, %32 : vector<128x128xf32>
    %34 = vector.broadcast %25 : vector<1x128xf32> to vector<128x128xf32>
    %35 = arith.mulf %21, %34 : vector<128x128xf32>
    %cst_20 = arith.constant 2.000000e+00 : f32
    %36 = vector.broadcast %cst_20 : f32 to vector<128x128xf32>
    %37 = arith.mulf %36, %35 : vector<128x128xf32>
    %38 = arith.mulf %37, %22 : vector<128x128xf32>
    %39 = arith.addf %33, %38 : vector<128x128xf32>
    %cst_21 = arith.constant 1.000000e+00 : f32
    %40 = vector.broadcast %cst_21 : f32 to vector<1x128xf32>
    %cst_22 = arith.constant dense<0.000000e+00> : vector<1x128xf32>
    %41 = tpu.matmul %40, %39, %cst_22 {dimension_numbers = #tpu.dot_dimension_numbers<[1], [1], [0], [0], [0, 0, 1, 0], [], []>} : vector<1x128xf32>, vector<128x128xf32>, vector<1x128xf32> -> vector<1x128xf32>
    %c0_23 = arith.constant 0 : index
    %c0_24 = arith.constant 0 : index
    %42 = vector.load %arg9[%c0_23, %c0_24] : memref<1x128xf32, #tpu.memory_space<vmem>>, vector<1x128xf32>
    tpu.vector_store %arg9[%c0_23, %c0_24], %41 {strides = array<i32>} : memref<1x128xf32, #tpu.memory_space<vmem>>, vector<1x128xf32>,
    return
  }
  func.func @transform_0(%arg0: i32) -> (i32, i32) {
    %c0_i32 = arith.constant 0 : i32
    %c0_i32_0 = arith.constant 0 : i32
    return %arg0, %c0_i32 : i32, i32
  }
  func.func @transform_1(%arg0: i32) -> (i32, i32) {
    %c0_i32 = arith.constant 0 : i32
    %c0_i32_0 = arith.constant 0 : i32
    return %arg0, %c0_i32 : i32, i32
  }
  func.func @transform_2(%arg0: i32) -> (i32, i32) {
    %c0_i32 = arith.constant 0 : i32
    %c0_i32_0 = arith.constant 0 : i32
    %c0_i32_1 = arith.constant 0 : i32
    return %c0_i32, %c0_i32_0 : i32, i32
  }
  func.func @transform_3(%arg0: i32) -> (i32, i32) {
    %c0_i32 = arith.constant 0 : i32
    %c0_i32_0 = arith.constant 0 : i32
    %c0_i32_1 = arith.constant 0 : i32
    return %c0_i32, %c0_i32_0 : i32, i32
  }
  func.func @transform_4(%arg0: i32) -> (i32, i32) {
    %c0_i32 = arith.constant 0 : i32
    %c0_i32_0 = arith.constant 0 : i32
    %c0_i32_1 = arith.constant 0 : i32
    return %c0_i32, %c0_i32_0 : i32, i32
  }
  func.func @transform_5(%arg0: i32) -> (i32, i32) {
    %c0_i32 = arith.constant 0 : i32
    %c0_i32_0 = arith.constant 0 : i32
    %c0_i32_1 = arith.constant 0 : i32
    return %c0_i32, %c0_i32_0 : i32, i32
  }
  func.func @transform_6(%arg0: i32) -> (i32, i32) {
    %c0_i32 = arith.constant 0 : i32
    %c0_i32_0 = arith.constant 0 : i32
    %c0_i32_1 = arith.constant 0 : i32
    return %c0_i32, %c0_i32_0 : i32, i32
  }
  func.func @transform_7(%arg0: i32) -> (i32, i32) {
    %c0_i32 = arith.constant 0 : i32
    %c0_i32_0 = arith.constant 0 : i32
    %c0_i32_1 = arith.constant 0 : i32
    return %c0_i32, %c0_i32_0 : i32, i32
  }
  func.func @transform_8(%arg0: i32) -> (i32, i32) {
    %c0_i32 = arith.constant 0 : i32
    %c0_i32_0 = arith.constant 0 : i32
    return %c0_i32, %arg0 : i32, i32
  }
}

</mosaic_0001>

<bundles_post_ra>
// kernel: tpu_custom_call.1
= control target key start
LH: loop header
LB: loop body
LE: loop exit
PB: predicated region body
PF: predicated region fallthrough
CT: control target
= control target key end

     0   :  { %13 = vsyncpa [#allocation3], 0  ;;  %s2355_s0 = inlined_call_operand.hbm [shape: f32[128,128], index: 0, kind: input, shape index: {}]   ;;  %s2356_s1 = inlined_call_operand.hbm [shape: f32[128,128], index: 1, kind: input, shape index: {}]   ;;  %s2357_s2 = inlined_call_operand.hbm [shape: f32[128,128], index: 2, kind: input, shape index: {}]   ;;  %s2358_s3 = inlined_call_operand.hbm [shape: f32[1,128], index: 3, kind: input, shape index: {}]   ;;  %s2359_s4 = inlined_call_operand.hbm [shape: f32[128,128], index: 4, kind: input, shape index: {}]   ;;  %s2360_s5 = inlined_call_operand.hbm [shape: f32[1,128], index: 5, kind: input, shape index: {}]   ;;  %s2361_s6 = inlined_call_operand.hbm [shape: f32[1,128], index: 6, kind: input, shape index: {}]   ;;  %s2362_s7 = inlined_call_operand.hbm [shape: f32[1,128], index: 7, kind: input, shape index: {}]   ;;  %s2363_s8 = inlined_call_operand.hbm [shape: f32[1,128], index: 8, kind: output, shape index: {}]  }
   0x1   :  { %14 = vsyncpa [#allocation6], 0 }
   0x2   :  { %15 = vsyncpa [#allocation9], 0 }
   0x3   :  { %16 = vsyncpa [#allocation12], 0 }
   0x4   :  { %17 = vsyncpa [#allocation15], 0 }
   0x5   :  { %18 = vsyncpa [#allocation4], 0  ;;  %s1788_s27 = smov [#allocation5]   ;;  %s1789_s29 = smov [#allocation8]  }
   0x6   :  { %s36_s28 = sshll.u32 %s1788_s27, 4  ;;  %s61_s30 = sshll.u32 %s1789_s29, 4  ;;  %s37_s28 = int_to_ptr.vmem [resolvable:$true] %s36_s28  ;;  %s1848_s30 = int_to_ptr.vmem [resolvable:$true] %s61_s30 }
   0x7   :  { %s1578_s11 = scalar_lea.hbm %s2356_s1, 2048 }
   0x8   :  { %p1579_p0 = scmp.ne.s32.totalorder %s2356_s1, %s1578_s11  ;;  %p1582_p1 = scmp.lt.u32.totalorder %s1578_s11, %s2356_s1 }
   0xa   :  { %p1584_p2 = pnand %p1582_p1, %p1579_p0 }
   0xc   :  { %1587 = shalt.err (!%p1584_p2)
}
   0xd   :  { %s1588_s16 = scalar_lea.vmem %s37_s28, 2048  ;;  %p1593_p4 = scmp.lt.s32.totalorder %s37_s28, %s37_s28 }
   0xe   :  { %p1589_p3 = scmp.ne.s32.totalorder %s37_s28, %s1588_s16  ;;  %p1594_p5 = scmp.lt.s32.totalorder %s1588_s16, %s1588_s16 }
  0x10   :  { %p1595_p6 = por %p1594_p5, %p1593_p4 }
  0x12   :  { %p1596_p7 = pnand %p1595_p6, %p1589_p3 }
  0x14   :  { %1599 = shalt.err (!%p1596_p7)
}
  0x15   :  { %s1790_s17 = smov 128   ;;  %s1791_s18 = smov 8  }
  0x16   :  { %42 = dma.hbm_to_vmem [thread:$0]  %s2356_s1, 2048, %s37_s28, [#allocation6], %s1790_s17, %s1790_s17, %s1791_s18  }
  0x17   :  { %s1600_s23 = scalar_lea.hbm %s2358_s3, 16 }
  0x18   :  { %p1601_p8 = scmp.ne.s32.totalorder %s2358_s3, %s1600_s23  ;;  %p1604_p9 = scmp.lt.u32.totalorder %s1600_s23, %s2358_s3 }
  0x1a   :  { %p1606_p10 = pnand %p1604_p9, %p1601_p8 }
  0x1c   :  { %1609 = shalt.err (!%p1606_p10)
}
  0x1d   :  { %s1610_s29 = scalar_lea.vmem %s1848_s30, 16  ;;  %s1614_s1 = scalar_lea.vmem %s1848_s30, 32 }
  0x1e   :  { %p1611_p11 = scmp.ne.s32.totalorder %s1848_s30, %s1610_s29  ;;  %p1615_p12 = scmp.lt.s32.totalorder %s1848_s30, %s1848_s30 }
  0x1f   :  { %p1616_p13 = scmp.lt.s32.totalorder %s1614_s1, %s1610_s29 }
  0x21   :  { %p1617_p0 = por %p1616_p13, %p1615_p12 }
  0x23   :  { %p1618_p1 = pnand %p1617_p0, %p1611_p11 }
  0x25   :  { %1621 = shalt.err (!%p1618_p1)
}
  0x26   :  { %64 = dma.hbm_to_vmem [thread:$0]  %s2358_s3, 16, %s1848_s30, [#allocation9]  }
  0x27   :  { %s1792_s10 = smov [#allocation11]   ;;  %s1793_s12 = smov [#allocation2]  }
  0x28   :  { %s83_s11 = sshll.u32 %s1792_s10, 4  ;;  %s24_s13 = sshll.u32 %s1793_s12, 4  ;;  %s84_s11 = int_to_ptr.vmem [resolvable:$true] %s83_s11  ;;  %s1883_s13 = int_to_ptr.vmem [resolvable:$true] %s24_s13 }
  0x29   :  { %s1622_s16 = scalar_lea.hbm %s2360_s5, 16 }
  0x2a   :  { %p1623_p2 = scmp.ne.s32.totalorder %s2360_s5, %s1622_s16  ;;  %p1626_p3 = scmp.lt.u32.totalorder %s1622_s16, %s2360_s5 }
  0x2c   :  { %p1628_p4 = pnand %p1626_p3, %p1623_p2 }
  0x2e   :  { %1631 = shalt.err (!%p1628_p4)
}
  0x2f   :  { %s1632_s3 = scalar_lea.vmem %s84_s11, 16  ;;  %s1636_s30 = scalar_lea.vmem %s84_s11, 32 }
  0x30   :  { %p1633_p5 = scmp.ne.s32.totalorder %s84_s11, %s1632_s3  ;;  %p1637_p6 = scmp.lt.s32.totalorder %s84_s11, %s84_s11 }
  0x31   :  { %p1638_p7 = scmp.lt.s32.totalorder %s1636_s30, %s1632_s3 }
  0x33   :  { %p1639_p8 = por %p1638_p7, %p1637_p6 }
  0x35   :  { %p1640_p9 = pnand %p1639_p8, %p1633_p5 }
  0x37   :  { %1643 = shalt.err (!%p1640_p9)
}
  0x38   :  { %86 = dma.hbm_to_vmem [thread:$0]  %s2360_s5, 16, %s84_s11, [#allocation12]  }
  0x39   :  { %s1644_s27 = scalar_lea.hbm %s2355_s0, 2048 }
  0x3a   :  { %p1645_p10 = scmp.ne.s32.totalorder %s2355_s0, %s1644_s27  ;;  %p1648_p11 = scmp.lt.u32.totalorder %s1644_s27, %s2355_s0 }
  0x3c   :  { %p1650_p12 = pnand %p1648_p11, %p1645_p10 }
  0x3e   :  { %1653 = shalt.err (!%p1650_p12)
}
  0x3f   :  { %s1654_s10 = scalar_lea.vmem %s1883_s13, 2048  ;;  %p1659_p0 = scmp.lt.s32.totalorder %s1883_s13, %s1883_s13 }
  0x40   :  { %p1655_p13 = scmp.ne.s32.totalorder %s1883_s13, %s1654_s10  ;;  %p1660_p1 = scmp.lt.s32.totalorder %s1654_s10, %s1654_s10 }
  0x42   :  { %p1661_p2 = por %p1660_p1, %p1659_p0 }
  0x44   :  { %p1662_p3 = pnand %p1661_p2, %p1655_p13 }
  0x46   :  { %1665 = shalt.err (!%p1662_p3)
}
  0x47   :  { %30 = dma.hbm_to_vmem [thread:$0]  %s2355_s0, 2048, %s1883_s13, [#allocation3], %s1790_s17, %s1790_s17, %s1791_s18  }
  0x48   :  { %s1794_s12 = smov [#allocation7]   ;;  %s1795_s15 = smov [#allocation10]  }
  0x49   :  { %s48_s14 = sshll.u32 %s1794_s12, 4  ;;  %s70_s16 = sshll.u32 %s1795_s15, 4  ;;  %s49_s14 = int_to_ptr.vmem [resolvable:$true] %s48_s14  ;;  %s1917_s16 = int_to_ptr.vmem [resolvable:$true] %s70_s16 }
  0x4a   :  { %s1666_s21 = scalar_lea.hbm %s2357_s2, 2048 }
  0x4b   :  { %p1667_p4 = scmp.ne.s32.totalorder %s2357_s2, %s1666_s21  ;;  %p1670_p5 = scmp.lt.u32.totalorder %s1666_s21, %s2357_s2 }
  0x4d   :  { %p1672_p6 = pnand %p1670_p5, %p1667_p4 }
  0x4f   :  { %1675 = shalt.err (!%p1672_p6)
}
  0x50   :  { %s1676_s0 = scalar_lea.vmem %s49_s14, 2048  ;;  %p1681_p8 = scmp.lt.s32.totalorder %s49_s14, %s49_s14 }
  0x51   :  { %p1677_p7 = scmp.ne.s32.totalorder %s49_s14, %s1676_s0  ;;  %p1682_p9 = scmp.lt.s32.totalorder %s1676_s0, %s1676_s0 }
  0x53   :  { %p1683_p10 = por %p1682_p9, %p1681_p8 }
  0x55   :  { %p1684_p11 = pnand %p1683_p10, %p1677_p7 }
  0x57   :  { %1687 = shalt.err (!%p1684_p11)
}
  0x58   :  { %54 = dma.hbm_to_vmem [thread:$0]  %s2357_s2, 2048, %s49_s14, [#allocation6], %s1790_s17, %s1790_s17, %s1791_s18  }
  0x59   :  { %s1688_s27 = scalar_lea.hbm %s2359_s4, 2048 }
  0x5a   :  { %p1689_p12 = scmp.ne.s32.totalorder %s2359_s4, %s1688_s27  ;;  %p1692_p13 = scmp.lt.u32.totalorder %s1688_s27, %s2359_s4 }
  0x5c   :  { %p1694_p0 = pnand %p1692_p13, %p1689_p12 }
  0x5e   :  { %1697 = shalt.err (!%p1694_p0)
}
  0x5f   :  { %s1698_s10 = scalar_lea.vmem %s1917_s16, 2048  ;;  %p1703_p2 = scmp.lt.s32.totalorder %s1917_s16, %s1917_s16 }
  0x60   :  { %p1699_p1 = scmp.ne.s32.totalorder %s1917_s16, %s1698_s10  ;;  %p1704_p3 = scmp.lt.s32.totalorder %s1698_s10, %s1698_s10 }
  0x62   :  { %p1705_p4 = por %p1704_p3, %p1703_p2 }
  0x64   :  { %p1706_p5 = pnand %p1705_p4, %p1699_p1 }
  0x66   :  { %1709 = shalt.err (!%p1706_p5)
}
  0x67   :  { %76 = dma.hbm_to_vmem [thread:$0]  %s2359_s4, 2048, %s1917_s16, [#allocation9], %s1790_s17, %s1790_s17, %s1791_s18  }
  0x68   :  { %s1796_s11 = smov [#allocation13]   ;;  %s1797_s14 = smov [#allocation14]  }
  0x69   :  { %s93_s12 = sshll.u32 %s1796_s11, 4  ;;  %s103_s15 = sshll.u32 %s1797_s14, 4  ;;  %s94_s12 = int_to_ptr.vmem [resolvable:$true] %s93_s12  ;;  %s104_s15 = int_to_ptr.vmem [resolvable:$true] %s103_s15 }
  0x6a   :  { %s1710_s21 = scalar_lea.hbm %s2361_s6, 16 }
  0x6b   :  { %p1711_p6 = scmp.ne.s32.totalorder %s2361_s6, %s1710_s21  ;;  %p1714_p7 = scmp.lt.u32.totalorder %s1710_s21, %s2361_s6 }
  0x6d   :  { %p1716_p8 = pnand %p1714_p7, %p1711_p6 }
  0x6f   :  { %1719 = shalt.err (!%p1716_p8)
}
  0x70   :  { %s1720_s4 = scalar_lea.vmem %s94_s12, 16  ;;  %s1724_s17 = scalar_lea.vmem %s94_s12, 32 }
  0x71   :  { %p1721_p9 = scmp.ne.s32.totalorder %s94_s12, %s1720_s4  ;;  %p1725_p10 = scmp.lt.s32.totalorder %s94_s12, %s94_s12 }
  0x72   :  { %p1726_p11 = scmp.lt.s32.totalorder %s1724_s17, %s1720_s4 }
  0x74   :  { %p1727_p12 = por %p1726_p11, %p1725_p10 }
  0x76   :  { %p1728_p13 = pnand %p1727_p12, %p1721_p9 }
  0x78   :  { %1731 = shalt.err (!%p1728_p13)
}
  0x79   :  { %96 = dma.hbm_to_vmem [thread:$0]  %s2361_s6, 16, %s94_s12, [#allocation12]  }
  0x7a   :  { %s1732_s24 = scalar_lea.hbm %s2362_s7, 16 }
  0x7b   :  { %p1733_p0 = scmp.ne.s32.totalorder %s2362_s7, %s1732_s24  ;;  %p1736_p1 = scmp.lt.u32.totalorder %s1732_s24, %s2362_s7 }
  0x7d   :  { %p1738_p2 = pnand %p1736_p1, %p1733_p0 }
  0x7f   :  { %1741 = shalt.err (!%p1738_p2)
}
  0x80   :  { %s1742_s1 = scalar_lea.vmem %s104_s15, 16  ;;  %s1746_s28 = scalar_lea.vmem %s104_s15, 32 }
  0x81   :  { %p1743_p3 = scmp.ne.s32.totalorder %s104_s15, %s1742_s1  ;;  %p1747_p4 = scmp.lt.s32.totalorder %s104_s15, %s104_s15 }
  0x82   :  { %p1748_p5 = scmp.lt.s32.totalorder %s1746_s28, %s1742_s1 }
  0x84   :  { %p1749_p6 = por %p1748_p5, %p1747_p4 }
  0x86   :  { %p1750_p7 = pnand %p1749_p6, %p1743_p3 }
  0x88   :  { %1753 = shalt.err (!%p1750_p7)
}
  0x89   :  { %106 = dma.hbm_to_vmem [thread:$0]  %s2362_s7, 16, %s104_s15, [#allocation15]  }
  0x8a   :  { %1776 = dma.done.wait [#allocation3], 2048  }
  0x8b   :  { %1777 = vsyncadd [#allocation3], 4294965248 }
  0x8c   :  { %1778 = dma.done.wait [#allocation6], 4096  }
  0x8d   :  { %1779 = vsyncadd [#allocation6], 4294963200 }
  0x8e   :  { %1780 = dma.done.wait [#allocation9], 2064  }
  0x8f   :  { %1781 = vsyncadd [#allocation9], 4294965232 }
  0x90   :  { %1782 = dma.done.wait [#allocation12], 32  }
  0x91   :  { %1783 = vsyncadd [#allocation12], 4294967264 }
  0x92   :  { %1784 = dma.done.wait [#allocation15], 16  }
  0x93   :  { %1785 = vsyncadd [#allocation15], 4294967280  ;;  %v163_v0 = vld [vmem:[#allocation7] sm:$0xff]  ;;  %v164_v1 = vld [vmem:[#allocation7 + $0x8] sm:$0xff]  ;;  %vm1799_vm0 = vmmov 0   ;;  %s1802_s7 = smov [#allocation16]  }
  0x94   :  { %v165_v2 = vld [vmem:[#allocation7 + $0x10] sm:$0xff]  ;;  %v1411_v3 = vpack.c.bf16 %v164_v1, %v163_v0  ;;  %v166_v4 = vld [vmem:[#allocation7 + $0x18] sm:$0xff]  ;;  %v131_v6 = vld [vmem:[#allocation2] sm:$0xff]  ;;  %s1087_s10 = sshll.u32 %s1802_s7, 4  ;;  %s1088_s10 = int_to_ptr.vmem [resolvable:$true] %s1087_s10 }
  0x95   :  { %v1415_v5 = vpack.c.bf16 %v166_v4, %v165_v2  ;;  %v167_v7 = vld [vmem:[#allocation7 + $0x20] sm:$0xff]  ;;  %v168_v8 = vld [vmem:[#allocation7 + $0x28] sm:$0xff]  ;;  %1248 = vmatprep.mubr.f32.mxu0 %v131_v6  ;;  %v169_v10 = vld [vmem:[#allocation7 + $0x30] sm:$0xff]  ;;  %s1754_s2 = scalar_lea.vmem %s1088_s10, 16  ;;  %s1758_s5 = scalar_lea.vmem %s1088_s10, 32 }
  0x96   :  { %1412 = vmatprep.subr.bf16.mxu0 %v1411_v3  ;;  %v1419_v9 = vpack.c.bf16 %v168_v8, %v167_v7  ;;  %v170_v11 = vld [vmem:[#allocation7 + $0x38] sm:$0xff]  ;;  %v171_v13 = vld [vmem:[#allocation7 + $0x40] sm:$0xff]  ;;  %v172_v14 = vld [vmem:[#allocation7 + $0x48] sm:$0xff]  ;;  %p1755_p8 = scmp.ne.s32.totalorder %s1088_s10, %s1754_s2  ;;  %p1759_p9 = scmp.lt.s32.totalorder %s1088_s10, %s1088_s10 }
  0x97   :  { %1414 = vmatpush3.bf16.xpose.msra.mxu0 %v1411_v3  ;;  %v1423_v12 = vpack.c.bf16 %v170_v11, %v169_v10  ;;  %v1427_v15 = vpack.c.bf16 %v172_v14, %v171_v13  ;;  %v173_v16 = vld [vmem:[#allocation7 + $0x50] sm:$0xff]  ;;  %v174_v17 = vld [vmem:[#allocation7 + $0x58] sm:$0xff]  ;;  %v175_v19 = vld [vmem:[#allocation7 + $0x60] sm:$0xff]  ;;  %p1760_p10 = scmp.lt.s32.totalorder %s1758_s5, %s1754_s2 }
  0x98   :  { %1416 = vmatprep.subr.bf16.mxu0 %v1415_v5  ;;  %v1431_v18 = vpack.c.bf16 %v174_v17, %v173_v16  ;;  %v176_v20 = vld [vmem:[#allocation7 + $0x68] sm:$0xff]  ;;  %v177_v22 = vld [vmem:[#allocation7 + $0x70] sm:$0xff]  ;;  %v178_v23 = vld [vmem:[#allocation7 + $0x78] sm:$0xff] }
  0x99   :  { %v1435_v21 = vpack.c.bf16 %v176_v20, %v175_v19  ;;  %v1439_v24 = vpack.c.bf16 %v178_v23, %v177_v22  ;;  %v132_v25 = vld [vmem:[#allocation2 + $0x8] sm:$0xff]  ;;  %v133_v26 = vld [vmem:[#allocation2 + $0x10] sm:$0xff]  ;;  %v134_v27 = vld [vmem:[#allocation2 + $0x18] sm:$0xff]  ;;  %p1761_p11 = por %p1760_p10, %p1759_p9 }
  0x9a   :  { %v135_v28 = vld [vmem:[#allocation2 + $0x20] sm:$0xff]  ;;  %v136_v29 = vld [vmem:[#allocation2 + $0x28] sm:$0xff]  ;;  %v137_v30 = vld [vmem:[#allocation2 + $0x30] sm:$0xff] }
  0x9b   :  { %v138_v31 = vld [vmem:[#allocation2 + $0x38] sm:$0xff]  ;;  %v139_v32 = vld [vmem:[#allocation2 + $0x40] sm:$0xff]  ;;  %v140_v33 = vld [vmem:[#allocation2 + $0x48] sm:$0xff]  ;;  %p1762_p12 = pnand %p1761_p11, %p1755_p8 }
  0x9c   :  { %v141_v34 = vld [vmem:[#allocation2 + $0x50] sm:$0xff]  ;;  %v142_v35 = vld [vmem:[#allocation2 + $0x58] sm:$0xff]  ;;  %v143_v36 = vld [vmem:[#allocation2 + $0x60] sm:$0xff] }
  0x9d   :  { %v144_v37 = vld [vmem:[#allocation2 + $0x68] sm:$0xff]  ;;  %v145_v38 = vld [vmem:[#allocation2 + $0x70] sm:$0xff]  ;;  %v146_v39 = vld [vmem:[#allocation2 + $0x78] sm:$0xff] }
  0x9e   :  { %v147_v40 = vld [vmem:[#allocation5] sm:$0xff]  ;;  %v148_v41 = vld [vmem:[#allocation5 + $0x8] sm:$0xff]  ;;  %v149_v42 = vld [vmem:[#allocation5 + $0x10] sm:$0xff] }
  0x9f   :  { %1418 = vmatpush3.bf16.xpose.msra.mxu0 %v1415_v5  ;;  %v150_v43 = vld [vmem:[#allocation5 + $0x18] sm:$0xff]  ;;  %v151_v44 = vld [vmem:[#allocation5 + $0x20] sm:$0xff]  ;;  %v152_v45 = vld [vmem:[#allocation5 + $0x28] sm:$0xff] }
  0xa0   :  { %1420 = vmatprep.subr.bf16.mxu0 %v1419_v9  ;;  %v153_v46 = vld [vmem:[#allocation5 + $0x30] sm:$0xff]  ;;  %v154_v47 = vld [vmem:[#allocation5 + $0x38] sm:$0xff]  ;;  %v155_v48 = vld [vmem:[#allocation5 + $0x40] sm:$0xff] }
  0xa1   :  { %v156_v49 = vld [vmem:[#allocation5 + $0x48] sm:$0xff]  ;;  %v157_v50 = vld [vmem:[#allocation5 + $0x50] sm:$0xff]  ;;  %v158_v51 = vld [vmem:[#allocation5 + $0x58] sm:$0xff] }
  0xa2   :  { %v159_v52 = vld [vmem:[#allocation5 + $0x60] sm:$0xff]  ;;  %v160_v53 = vld [vmem:[#allocation5 + $0x68] sm:$0xff]  ;;  %v161_v54 = vld [vmem:[#allocation5 + $0x70] sm:$0xff] }
  0xa3   :  { %v162_v55 = vld [vmem:[#allocation5 + $0x78] sm:$0xff]  ;;  %v603_v56 = vld [vmem:[#allocation10] sm:$0xff]  ;;  %v604_v57 = vld [vmem:[#allocation10 + $0x8] sm:$0xff] }
  0xa4   :  { %v605_v58 = vld [vmem:[#allocation10 + $0x10] sm:$0xff]  ;;  %v1443_v59 = vpack.c.bf16 %v604_v57, %v603_v56  ;;  %v606_v60 = vld [vmem:[#allocation10 + $0x18] sm:$0xff]  ;;  %v607_v62 = vld [vmem:[#allocation10 + $0x20] sm:$0xff] }
  0xa5   :  { %v1447_v61 = vpack.c.bf16 %v606_v60, %v605_v58  ;;  %v608_v63 = vld [vmem:[#allocation10 + $0x28] sm:$0xff]  ;;  %v609_v1 = vld [vmem:[#allocation10 + $0x30] sm:$0xff]  ;;  %v610_v2 = vld [vmem:[#allocation10 + $0x38] sm:$0xff] }
  0xa6   :  { %1444 = vmatprep.subr.bf16.mxu1 %v1443_v59  ;;  %v1451_v0 = vpack.c.bf16 %v608_v63, %v607_v62  ;;  %v1455_v3 = vpack.c.bf16 %v610_v2, %v609_v1  ;;  %v611_v4 = vld [vmem:[#allocation10 + $0x40] sm:$0xff]  ;;  %v612_v5 = vld [vmem:[#allocation10 + $0x48] sm:$0xff]  ;;  %v613_v7 = vld [vmem:[#allocation10 + $0x50] sm:$0xff] }
  0xa7   :  { %1422 = vmatpush3.bf16.xpose.msra.mxu0 %v1419_v9  ;;  %1446 = vmatpush3.bf16.xpose.msra.mxu1 %v1443_v59  ;;  %v1459_v6 = vpack.c.bf16 %v612_v5, %v611_v4  ;;  %v614_v8 = vld [vmem:[#allocation10 + $0x58] sm:$0xff]  ;;  %v617_v57 = vld [vmem:[#allocation10 + $0x70] sm:$0xff] }
  0xa8   :  { %1424 = vmatprep.subr.bf16.mxu0 %v1423_v12  ;;  %1448 = vmatprep.subr.bf16.mxu1 %v1447_v61  ;;  %v1463_v9 = vpack.c.bf16 %v614_v8, %v613_v7  ;;  %v1978_v10 = vld [vmem:[#allocation8] ss:$0 sm:$0xff] }
  0xa9   :  { %v618_v58 = vld [vmem:[#allocation10 + $0x78] sm:$0xff] }
  0xaa   :  { %v1471_v60 = vpack.c.bf16 %v618_v58, %v617_v57 }
  0xaf   :  { %1426 = vmatpush3.bf16.xpose.msra.mxu0 %v1423_v12  ;;  %1450 = vmatpush3.bf16.xpose.msra.mxu1 %v1447_v61 }
  0xb0   :  { %1428 = vmatprep.subr.bf16.mxu0 %v1427_v15  ;;  %1452 = vmatprep.subr.bf16.mxu1 %v1451_v0 }
  0xb7   :  { %1430 = vmatpush3.bf16.xpose.msra.mxu0 %v1427_v15  ;;  %1454 = vmatpush3.bf16.xpose.msra.mxu1 %v1451_v0 }
  0xb8   :  { %1432 = vmatprep.subr.bf16.mxu0 %v1431_v18  ;;  %1456 = vmatprep.subr.bf16.mxu1 %v1455_v3 }
  0xbf   :  { %1434 = vmatpush3.bf16.xpose.msra.mxu0 %v1431_v18  ;;  %1458 = vmatpush3.bf16.xpose.msra.mxu1 %v1455_v3 }
  0xc0   :  { %1436 = vmatprep.subr.bf16.mxu0 %v1435_v21  ;;  %1460 = vmatprep.subr.bf16.mxu1 %v1459_v6 }
  0xc7   :  { %1438 = vmatpush3.bf16.xpose.msra.mxu0 %v1435_v21  ;;  %1462 = vmatpush3.bf16.xpose.msra.mxu1 %v1459_v6 }
  0xc8   :  { %1440 = vmatprep.subr.bf16.mxu0 %v1439_v24  ;;  %1464 = vmatprep.subr.bf16.mxu1 %v1463_v9 }
  0xcf   :  { %1442 = vmatpush3.bf16.xpose.msra.mxu0 %v1439_v24  ;;  %1466 = vmatpush3.bf16.xpose.msra.mxu1 %v1463_v9 }
  0xd6   :  { %1249 = vmatmul.mubr.f32.vlgmr.msra.gmra.mrb[0].mxu0 %v132_v25 }
  0xd7   :  { %1251 = vmatprep.mubr.f32.mxu0 %v133_v26 }
  0xda   :  { %1252 = vmatmul.mubr.f32.gmra.mrb[2].mxu0 %v134_v27 }
  0xdb   :  { %1254 = vmatprep.mubr.f32.mxu0 %v135_v28 }
  0xde   :  { %1255 = vmatmul.mubr.f32.gmra.mrb[4].mxu0 %v136_v29 }
  0xdf   :  { %1257 = vmatprep.mubr.f32.mxu0 %v137_v30 }
  0xe2   :  { %1258 = vmatmul.mubr.f32.gmra.mrb[6].mxu0 %v138_v31 }
  0xe3   :  { %1260 = vmatprep.mubr.f32.mxu0 %v139_v32 }
  0xe6   :  { %1261 = vmatmul.mubr.f32.gmra.mrb[8].mxu0 %v140_v33 }
  0xe7   :  { %1263 = vmatprep.mubr.f32.mxu0 %v141_v34 }
  0xea   :  { %1264 = vmatmul.mubr.f32.gmra.mrb[10].mxu0 %v142_v35 }
  0xeb   :  { %1266 = vmatprep.mubr.f32.mxu0 %v143_v36 }
  0xee   :  { %1267 = vmatmul.mubr.f32.gmra.mrb[12].mxu0 %v144_v37 }
  0xef   :  { %1269 = vmatprep.mubr.f32.mxu0 %v145_v38 }
  0xf2   :  { %1270 = vmatmul.mubr.f32.gmra.mrb[14].mxu0 %v146_v39 }
  0xf3   :  { %1272 = vmatprep.mubr.f32.mxu0 %v147_v40 }
  0xf6   :  { %1273 = vmatmul.mubr.f32.gmra.mrb[16].mxu0 %v148_v41  ;;  %v615_v41 = vld [vmem:[#allocation10 + $0x60] sm:$0xff] }
  0xf7   :  { %1275 = vmatprep.mubr.f32.mxu0 %v149_v42  ;;  %v616_v42 = vld [vmem:[#allocation10 + $0x68] sm:$0xff] }
  0xfa   :  { %1276 = vmatmul.mubr.f32.gmra.mrb[18].mxu0 %v150_v43 }
  0xfb   :  { %1278 = vmatprep.mubr.f32.mxu0 %v151_v44  ;;  %v1467_v44 = vpack.c.bf16 %v616_v42, %v615_v41 }
  0xfd   :  { %1468 = vmatprep.subr.bf16.mxu1 %v1467_v44 }
  0xfe   :  { %1279 = vmatmul.mubr.f32.gmra.mrb[20].mxu0 %v152_v45  ;;  %1470 = vmatpush3.bf16.xpose.msra.mxu1 %v1467_v44 }
  0xff   :  { %1281 = vmatprep.mubr.f32.mxu0 %v153_v46  ;;  %1472 = vmatprep.subr.bf16.mxu1 %v1471_v60 }
 0x102   :  { %1282 = vmatmul.mubr.f32.gmra.mrb[22].mxu0 %v154_v47 }
 0x103   :  { %1284 = vmatprep.mubr.f32.mxu0 %v155_v48 }
 0x106   :  { %1285 = vmatmul.mubr.f32.gmra.mrb[24].mxu0 %v156_v49  ;;  %1474 = vmatpush3.bf16.xpose.msra.mxu1 %v1471_v60 }
 0x107   :  { %1287 = vmatprep.mubr.f32.mxu0 %v157_v50 }
 0x10a   :  { %1288 = vmatmul.mubr.f32.gmra.mrb[26].mxu0 %v158_v51 }
 0x10b   :  { %1290 = vmatprep.mubr.f32.mxu0 %v159_v52 }
 0x10e   :  { %1291 = vmatmul.mubr.f32.gmra.mrb[28].mxu0 %v160_v53 }
 0x10f   :  { %1293 = vmatprep.mubr.f32.mxu0 %v161_v54 }
 0x112   :  { %1294 = vmatmul.mubr.f32.gmra.mrb[30].mxu0 %v162_v55 }
 0x1a9   :  { %v1250_v11 = vpop.f32.mrb[0].mxu0 }
 0x1aa   :  { %v252_v12 = vpop.f32.mrb[1].mxu0  ;;  %v1984_v14 = vadd.f32 %v1250_v11, %v1978_v10 }
 0x1ab   :  { %v1981_v13 = vadd.f32 %v1978_v10, %v252_v12 }
 0x1ac   :  { %v412_v22 = vmul.f32 %v1984_v14, %v1984_v14 }
 0x1ad   :  { %v1253_v15 = vpop.f32.mrb[2].mxu0  ;;  %v411_v16 = vmul.f32 %v1981_v13, %v1981_v13 }
 0x1ae   :  { %v262_v17 = vpop.f32.mrb[3].mxu0  ;;  %v1992_v19 = vadd.f32 %v1253_v15, %v1978_v10 }
 0x1af   :  { %v1989_v18 = vadd.f32 %v1978_v10, %v262_v17  ;;  %443 = vadd.xlane.f32.xlu0 %v411_v16 }
 0x1b0   :  { %v414_v27 = vmul.f32 %v1992_v19, %v1992_v19 }
 0x1b1   :  { %v1256_v20 = vpop.f32.mrb[4].mxu0  ;;  %v413_v21 = vmul.f32 %v1989_v18, %v1989_v18 }
 0x1b2   :  { %v272_v23 = vpop.f32.mrb[5].mxu0  ;;  %v2002_v25 = vadd.f32 %v1256_v20, %v1978_v10 }
 0x1b3   :  { %v1999_v24 = vadd.f32 %v1978_v10, %v272_v23  ;;  %447 = vadd.xlane.f32.xlu1 %v413_v21  ;;  %445 = vadd.xlane.f32.xlu0 %v412_v22 }
 0x1b4   :  { %v416_v33 = vmul.f32 %v2002_v25, %v2002_v25 }
 0x1b5   :  { %v1259_v26 = vpop.f32.mrb[6].mxu0  ;;  %v415_v28 = vmul.f32 %v1999_v24, %v1999_v24 }
 0x1b6   :  { %v282_v29 = vpop.f32.mrb[7].mxu0  ;;  %v2012_v31 = vadd.f32 %v1259_v26, %v1978_v10 }
 0x1b7   :  { %v2009_v30 = vadd.f32 %v1978_v10, %v282_v29  ;;  %449 = vadd.xlane.f32.xlu1 %v414_v27  ;;  %451 = vadd.xlane.f32.xlu0 %v415_v28 }
 0x1b8   :  { %v418_v39 = vmul.f32 %v2012_v31, %v2012_v31 }
 0x1b9   :  { %v1262_v32 = vpop.f32.mrb[8].mxu0  ;;  %v417_v34 = vmul.f32 %v2009_v30, %v2009_v30 }
 0x1ba   :  { %v292_v35 = vpop.f32.mrb[9].mxu0  ;;  %v2022_v37 = vadd.f32 %v1262_v32, %v1978_v10 }
 0x1bb   :  { %v2019_v36 = vadd.f32 %v1978_v10, %v292_v35  ;;  %453 = vadd.xlane.f32.xlu1 %v416_v33  ;;  %455 = vadd.xlane.f32.xlu0 %v417_v34 }
 0x1bc   :  { %v420_v48 = vmul.f32 %v2022_v37, %v2022_v37 }
 0x1bd   :  { %v1265_v38 = vpop.f32.mrb[10].mxu0  ;;  %v419_v40 = vmul.f32 %v2019_v36, %v2019_v36 }
 0x1be   :  { %v302_v43 = vpop.f32.mrb[11].mxu0  ;;  %v2032_v46 = vadd.f32 %v1265_v38, %v1978_v10 }
 0x1bf   :  { %v2029_v45 = vadd.f32 %v1978_v10, %v302_v43  ;;  %457 = vadd.xlane.f32.xlu1 %v418_v39  ;;  %459 = vadd.xlane.f32.xlu0 %v419_v40 }
 0x1c0   :  { %v422_v54 = vmul.f32 %v2032_v46, %v2032_v46 }
 0x1c1   :  { %v1268_v47 = vpop.f32.mrb[12].mxu0  ;;  %v421_v49 = vmul.f32 %v2029_v45, %v2029_v45 }
 0x1c2   :  { %v312_v50 = vpop.f32.mrb[13].mxu0  ;;  %v2042_v52 = vadd.f32 %v1268_v47, %v1978_v10 }
 0x1c3   :  { %v2039_v51 = vadd.f32 %v1978_v10, %v312_v50  ;;  %461 = vadd.xlane.f32.xlu1 %v420_v48  ;;  %463 = vadd.xlane.f32.xlu0 %v421_v49 }
 0x1c4   :  { %v424_v63 = vmul.f32 %v2042_v52, %v2042_v52 }
 0x1c5   :  { %v1271_v53 = vpop.f32.mrb[14].mxu0  ;;  %v423_v55 = vmul.f32 %v2039_v51, %v2039_v51 }
 0x1c6   :  { %v322_v56 = vpop.f32.mrb[15].mxu0  ;;  %v2052_v61 = vadd.f32 %v1271_v53, %v1978_v10 }
 0x1c7   :  { %v2049_v59 = vadd.f32 %v1978_v10, %v322_v56  ;;  %465 = vadd.xlane.f32.xlu1 %v422_v54  ;;  %467 = vadd.xlane.f32.xlu0 %v423_v55 }
 0x1c8   :  { %v426_v5 = vmul.f32 %v2052_v61, %v2052_v61 }
 0x1c9   :  { %v1274_v62 = vpop.f32.mrb[16].mxu0  ;;  %v425_v0 = vmul.f32 %v2049_v59, %v2049_v59 }
 0x1ca   :  { %v332_v1 = vpop.f32.mrb[17].mxu0  ;;  %v2062_v3 = vadd.f32 %v1274_v62, %v1978_v10 }
 0x1cb   :  { %v2059_v2 = vadd.f32 %v1978_v10, %v332_v1  ;;  %469 = vadd.xlane.f32.xlu1 %v424_v63  ;;  %471 = vadd.xlane.f32.xlu0 %v425_v0 }
 0x1cc   :  { %v428_v12 = vmul.f32 %v2062_v3, %v2062_v3 }
 0x1cd   :  { %v1277_v4 = vpop.f32.mrb[18].mxu0  ;;  %v427_v6 = vmul.f32 %v2059_v2, %v2059_v2 }
 0x1ce   :  { %v342_v7 = vpop.f32.mrb[19].mxu0  ;;  %v2069_v8 = vadd.f32 %v1277_v4, %v1978_v10 }
 0x1cf   :  { %v2072_v9 = vadd.f32 %v1978_v10, %v342_v7  ;;  %473 = vadd.xlane.f32.xlu1 %v426_v5  ;;  %475 = vadd.xlane.f32.xlu0 %v427_v6 }
 0x1d0   :  { %v430_v21 = vmul.f32 %v2069_v8, %v2069_v8 }
 0x1d1   :  { %v1280_v11 = vpop.f32.mrb[20].mxu0  ;;  %v429_v15 = vmul.f32 %v2072_v9, %v2072_v9 }
 0x1d2   :  { %v352_v16 = vpop.f32.mrb[21].mxu0  ;;  %v2079_v17 = vadd.f32 %v1280_v11, %v1978_v10 }
 0x1d3   :  { %v2082_v20 = vadd.f32 %v1978_v10, %v352_v16  ;;  %477 = vadd.xlane.f32.xlu1 %v428_v12  ;;  %479 = vadd.xlane.f32.xlu0 %v429_v15 }
 0x1d4   :  { %v432_v29 = vmul.f32 %v2079_v17, %v2079_v17 }
 0x1d5   :  { %v1283_v22 = vpop.f32.mrb[22].mxu0  ;;  %v431_v23 = vmul.f32 %v2082_v20, %v2082_v20 }
 0x1d6   :  { %v362_v26 = vpop.f32.mrb[23].mxu0  ;;  %v2089_v27 = vadd.f32 %v1283_v22, %v1978_v10 }
 0x1d7   :  { %v2092_v28 = vadd.f32 %v1978_v10, %v362_v26  ;;  %481 = vadd.xlane.f32.xlu1 %v430_v21  ;;  %483 = vadd.xlane.f32.xlu0 %v431_v23 }
 0x1d8   :  { %v434_v39 = vmul.f32 %v2089_v27, %v2089_v27 }
 0x1d9   :  { %v1286_v32 = vpop.f32.mrb[24].mxu0  ;;  %v433_v33 = vmul.f32 %v2092_v28, %v2092_v28 }
 0x1da   :  { %v372_v34 = vpop.f32.mrb[25].mxu0  ;;  %v2099_v35 = vadd.f32 %v1286_v32, %v1978_v10 }
 0x1db   :  { %v2102_v38 = vadd.f32 %v1978_v10, %v372_v34  ;;  %485 = vadd.xlane.f32.xlu1 %v432_v29  ;;  %487 = vadd.xlane.f32.xlu0 %v433_v33 }
 0x1dc   :  { %v436_v47 = vmul.f32 %v2099_v35, %v2099_v35 }
 0x1dd   :  { %v1289_v40 = vpop.f32.mrb[26].mxu0  ;;  %v435_v41 = vmul.f32 %v2102_v38, %v2102_v38 }
 0x1de   :  { %v382_v42 = vpop.f32.mrb[27].mxu0  ;;  %v2109_v43 = vadd.f32 %v1289_v40, %v1978_v10 }
 0x1df   :  { %v2112_v44 = vadd.f32 %v1978_v10, %v382_v42  ;;  %489 = vadd.xlane.f32.xlu1 %v434_v39  ;;  %491 = vadd.xlane.f32.xlu0 %v435_v41 }
 0x1e0   :  { %v438_v55 = vmul.f32 %v2109_v43, %v2109_v43 }
 0x1e1   :  { %v1292_v48 = vpop.f32.mrb[28].mxu0  ;;  %v437_v49 = vmul.f32 %v2112_v44, %v2112_v44 }
 0x1e2   :  { %v392_v50 = vpop.f32.mrb[29].mxu0  ;;  %v2119_v53 = vadd.f32 %v1292_v48, %v1978_v10 }
 0x1e3   :  { %v2122_v54 = vadd.f32 %v1978_v10, %v392_v50  ;;  %493 = vadd.xlane.f32.xlu1 %v436_v47  ;;  %495 = vadd.xlane.f32.xlu0 %v437_v49 }
 0x1e4   :  { %v440_v63 = vmul.f32 %v2119_v53, %v2119_v53 }
 0x1e5   :  { %v1295_v56 = vpop.f32.mrb[30].mxu0  ;;  %v439_v57 = vmul.f32 %v2122_v54, %v2122_v54 }
 0x1e6   :  { %v2129_v58 = vadd.f32 %v1295_v56, %v1978_v10  ;;  %v402_v60 = vpop.f32.mrb[31].mxu0 }
 0x1e7   :  { %v2132_v62 = vadd.f32 %v1978_v10, %v402_v60  ;;  %497 = vadd.xlane.f32.xlu1 %v438_v55  ;;  %499 = vadd.xlane.f32.xlu0 %v439_v57 }
 0x1e8   :  { %v442_v1 = vmul.f32 %v2129_v58, %v2129_v58 }
 0x1e9   :  { %v441_v0 = vmul.f32 %v2132_v62, %v2132_v62 }
 0x1eb   :  { %501 = vadd.xlane.f32.xlu1 %v440_v63  ;;  %503 = vadd.xlane.f32.xlu0 %v441_v0 }
 0x1ef   :  { %505 = vadd.xlane.f32.xlu1 %v442_v1 }
 0x23c   :  { %v444_v4 = vpop.xlane.xlu0 %443 }
 0x23d   :  { %v507_v5 = vmax.f32 %v444_v4, 1e-24 }
 0x23f   :  { %1514 = vrsqrt.f32 %v507_v5 }
 0x240   :  { %v448_v6 = vpop.xlane.xlu1 %447  ;;  %v446_v10 = vpop.xlane.xlu0 %445 }
 0x241   :  { %v509_v7 = vmax.f32 %v448_v6, 1e-24  ;;  %v508_v11 = vmax.f32 %v446_v10, 1e-24 }
 0x243   :  { %1516 = vrsqrt.f32 %v509_v7 }
 0x244   :  { %1518 = vrsqrt.f32 %v508_v11  ;;  %v450_v12 = vpop.xlane.xlu1 %449  ;;  %v452_v15 = vpop.xlane.xlu0 %451 }
 0x245   :  { %v510_v16 = vmax.f32 %v450_v12, 1e-24  ;;  %v511_v21 = vmax.f32 %v452_v15, 1e-24 }
 0x247   :  { %1520 = vrsqrt.f32 %v510_v16 }
 0x248   :  { %1522 = vrsqrt.f32 %v511_v21  ;;  %v454_v22 = vpop.xlane.xlu1 %453  ;;  %v456_v23 = vpop.xlane.xlu0 %455 }
 0x249   :  { %v1515_v26 = vpop.eup %1514  ;;  %v512_v29 = vmax.f32 %v454_v22, 1e-24  ;;  %v513_v32 = vmax.f32 %v456_v23, 1e-24 }
 0x24a   :  { %v571_v33 = vmul.f32 %v1515_v26, %v1981_v13 }
 0x24b   :  { %1524 = vrsqrt.f32 %v512_v29 }
 0x24c   :  { %1526 = vrsqrt.f32 %v513_v32  ;;  %v458_v34 = vpop.xlane.xlu1 %457  ;;  %1328 = vmatprep.mubr.f32.mxu1 %v571_v33  ;;  %v460_v39 = vpop.xlane.xlu0 %459 }
 0x24d   :  { %v1517_v40 = vpop.eup %1516  ;;  %v514_v41 = vmax.f32 %v458_v34, 1e-24  ;;  %v515_v42 = vmax.f32 %v460_v39, 1e-24 }
 0x24e   :  { %v1519_v47 = vpop.eup %1518  ;;  %v573_v48 = vmul.f32 %v1517_v40, %v1989_v18 }
 0x24f   :  { %1528 = vrsqrt.f32 %v514_v41  ;;  %v572_v49 = vmul.f32 %v1519_v47, %v1984_v14 }
 0x250   :  { %1530 = vrsqrt.f32 %v515_v42  ;;  %v462_v50 = vpop.xlane.xlu1 %461  ;;  %v464_v55 = vpop.xlane.xlu0 %463 }
 0x251   :  { %v1521_v56 = vpop.eup %1520  ;;  %v516_v57 = vmax.f32 %v462_v50, 1e-24  ;;  %1329 = vmatmul.mubr.f32.vlgmr.msra.gmra.mrb[0].mxu1 %v572_v49  ;;  %v517_v13 = vmax.f32 %v464_v55, 1e-24 }
 0x252   :  { %v1523_v60 = vpop.eup %1522  ;;  %1331 = vmatprep.mubr.f32.mxu1 %v573_v48  ;;  %v574_v63 = vmul.f32 %v1521_v56, %v1992_v19 }
 0x253   :  { %1532 = vrsqrt.f32 %v516_v57  ;;  %v575_v0 = vmul.f32 %v1523_v60, %v1999_v24 }
 0x254   :  { %1534 = vrsqrt.f32 %v517_v13  ;;  %v466_v1 = vpop.xlane.xlu1 %465  ;;  %v468_v18 = vpop.xlane.xlu0 %467 }
 0x255   :  { %v1525_v4 = vpop.eup %1524  ;;  %v518_v5 = vmax.f32 %v466_v1, 1e-24  ;;  %1332 = vmatmul.mubr.f32.gmra.mrb[2].mxu1 %v574_v63  ;;  %v519_v14 = vmax.f32 %v468_v18, 1e-24 }
 0x256   :  { %v1527_v6 = vpop.eup %1526  ;;  %1334 = vmatprep.mubr.f32.mxu1 %v575_v0  ;;  %v576_v10 = vmul.f32 %v1525_v4, %v2002_v25 }
 0x257   :  { %1536 = vrsqrt.f32 %v518_v5  ;;  %v577_v7 = vmul.f32 %v1527_v6, %v2009_v30 }
 0x258   :  { %1538 = vrsqrt.f32 %v519_v14  ;;  %v470_v11 = vpop.xlane.xlu1 %469  ;;  %v472_v19 = vpop.xlane.xlu0 %471 }
 0x259   :  { %v1529_v12 = vpop.eup %1528  ;;  %v520_v15 = vmax.f32 %v470_v11, 1e-24  ;;  %1335 = vmatmul.mubr.f32.gmra.mrb[4].mxu1 %v576_v10  ;;  %v521_v24 = vmax.f32 %v472_v19, 1e-24 }
 0x25a   :  { %v1531_v16 = vpop.eup %1530  ;;  %1337 = vmatprep.mubr.f32.mxu1 %v577_v7  ;;  %v578_v21 = vmul.f32 %v1529_v12, %v2012_v31 }
 0x25b   :  { %1540 = vrsqrt.f32 %v520_v15  ;;  %v579_v22 = vmul.f32 %v1531_v16, %v2019_v36 }
 0x25c   :  { %1542 = vrsqrt.f32 %v521_v24  ;;  %v474_v23 = vpop.xlane.xlu1 %473  ;;  %v476_v25 = vpop.xlane.xlu0 %475 }
 0x25d   :  { %v1533_v26 = vpop.eup %1532  ;;  %v522_v29 = vmax.f32 %v474_v23, 1e-24  ;;  %1338 = vmatmul.mubr.f32.gmra.mrb[6].mxu1 %v578_v21  ;;  %v523_v30 = vmax.f32 %v476_v25, 1e-24 }
 0x25e   :  { %v1535_v32 = vpop.eup %1534  ;;  %1340 = vmatprep.mubr.f32.mxu1 %v579_v22  ;;  %v580_v33 = vmul.f32 %v1533_v26, %v2022_v37 }
 0x25f   :  { %1544 = vrsqrt.f32 %v522_v29  ;;  %v581_v34 = vmul.f32 %v1535_v32, %v2029_v45 }
 0x260   :  { %1546 = vrsqrt.f32 %v523_v30  ;;  %v478_v39 = vpop.xlane.xlu1 %477  ;;  %v480_v31 = vpop.xlane.xlu0 %479 }
 0x261   :  { %v1537_v40 = vpop.eup %1536  ;;  %v524_v41 = vmax.f32 %v478_v39, 1e-24  ;;  %1341 = vmatmul.mubr.f32.gmra.mrb[8].mxu1 %v580_v33  ;;  %v525_v36 = vmax.f32 %v480_v31, 1e-24 }
 0x262   :  { %v1539_v42 = vpop.eup %1538  ;;  %1343 = vmatprep.mubr.f32.mxu1 %v581_v34  ;;  %v582_v47 = vmul.f32 %v1537_v40, %v2032_v46 }
 0x263   :  { %1548 = vrsqrt.f32 %v524_v41  ;;  %v583_v48 = vmul.f32 %v1539_v42, %v2039_v51 }
 0x264   :  { %1550 = vrsqrt.f32 %v525_v36  ;;  %v482_v49 = vpop.xlane.xlu1 %481  ;;  %v484_v37 = vpop.xlane.xlu0 %483 }
 0x265   :  { %v1541_v50 = vpop.eup %1540  ;;  %v526_v55 = vmax.f32 %v482_v49, 1e-24  ;;  %1344 = vmatmul.mubr.f32.gmra.mrb[10].mxu1 %v582_v47  ;;  %v527_v45 = vmax.f32 %v484_v37, 1e-24 }
 0x266   :  { %v1543_v56 = vpop.eup %1542  ;;  %1346 = vmatprep.mubr.f32.mxu1 %v583_v48  ;;  %v584_v57 = vmul.f32 %v1541_v50, %v2042_v52 }
 0x267   :  { %1552 = vrsqrt.f32 %v526_v55  ;;  %v585_v13 = vmul.f32 %v1543_v56, %v2049_v59  ;;  %v1798_v56 = vmov 0.0|0.0  }
 0x268   :  { %1554 = vrsqrt.f32 %v527_v45  ;;  %v486_v60 = vpop.xlane.xlu1 %485  ;;  %v488_v46 = vpop.xlane.xlu0 %487  ;;  %1475 = vmatprep.subr.bf16.mxu0 %v1798_v56 }
 0x269   :  { %v1545_v63 = vpop.eup %1544  ;;  %v528_v0 = vmax.f32 %v486_v60, 1e-24  ;;  %1347 = vmatmul.mubr.f32.gmra.mrb[12].mxu1 %v584_v57  ;;  %v529_v51 = vmax.f32 %v488_v46, 1e-24  ;;  %v941_v60 = vlaneseq }
 0x26a   :  { %v1547_v1 = vpop.eup %1546  ;;  %1349 = vmatprep.mubr.f32.mxu1 %v585_v13  ;;  %v586_v18 = vmul.f32 %v1545_v63, %v2052_v61 }
 0x26b   :  { %1556 = vrsqrt.f32 %v528_v0  ;;  %v587_v4 = vmul.f32 %v1547_v1, %v2059_v2  ;;  %v942_v63 = vshrl.u32 %v941_v60, 7  ;;  %v851_v0 = vld [vmem:[#allocation13] sm:$0x1]  ;;  %v2173_v1 = vld [vmem:[#allocation11] ss:$0 sm:$0xff] }
 0x26c   :  { %1558 = vrsqrt.f32 %v529_v51  ;;  %v490_v5 = vpop.xlane.xlu1 %489  ;;  %v492_v52 = vpop.xlane.xlu0 %491 }
 0x26d   :  { %v1549_v14 = vpop.eup %1548  ;;  %v530_v6 = vmax.f32 %v490_v5, 1e-24  ;;  %1350 = vmatmul.mubr.f32.gmra.mrb[14].mxu1 %v586_v18  ;;  %v531_v59 = vmax.f32 %v492_v52, 1e-24  ;;  %v943_v18 = vsub.s32 0, %v942_v63 }
 0x26e   :  { %v1551_v10 = vpop.eup %1550  ;;  %1352 = vmatprep.mubr.f32.mxu1 %v587_v4  ;;  %v588_v7 = vmul.f32 %v1549_v14, %v2062_v3  ;;  %v2176_v14 = vld [vmem:[#allocation14] ss:$0 sm:$0xff] }
 0x26f   :  { %1560 = vrsqrt.f32 %v530_v6  ;;  %v589_v11 = vmul.f32 %v1551_v10, %v2072_v9 }
 0x270   :  { %1562 = vrsqrt.f32 %v531_v59  ;;  %v494_v19 = vpop.xlane.xlu1 %493  ;;  %v496_v61 = vpop.xlane.xlu0 %495 }
 0x271   :  { %v1553_v12 = vpop.eup %1552  ;;  %v532_v15 = vmax.f32 %v494_v19, 1e-24  ;;  %1353 = vmatmul.mubr.f32.gmra.mrb[16].mxu1 %v588_v7  ;;  %v533_v2 = vmax.f32 %v496_v61, 1e-24 }
 0x272   :  { %v1555_v24 = vpop.eup %1554  ;;  %1355 = vmatprep.mubr.f32.mxu1 %v589_v11  ;;  %v590_v16 = vmul.f32 %v1553_v12, %v2069_v8 }
 0x273   :  { %1564 = vrsqrt.f32 %v532_v15  ;;  %v591_v21 = vmul.f32 %v1555_v24, %v2082_v20 }
 0x274   :  { %1566 = vrsqrt.f32 %v533_v2  ;;  %v498_v22 = vpop.xlane.xlu1 %497  ;;  %v500_v3 = vpop.xlane.xlu0 %499 }
 0x275   :  { %v1557_v23 = vpop.eup %1556  ;;  %v534_v25 = vmax.f32 %v498_v22, 1e-24  ;;  %1356 = vmatmul.mubr.f32.gmra.mrb[18].mxu1 %v590_v16  ;;  %v535_v9 = vmax.f32 %v500_v3, 1e-24 }
 0x276   :  { %v1559_v26 = vpop.eup %1558  ;;  %1358 = vmatprep.mubr.f32.mxu1 %v591_v21  ;;  %v592_v29 = vmul.f32 %v1557_v23, %v2079_v17 }
 0x277   :  { %1568 = vrsqrt.f32 %v534_v25  ;;  %v593_v30 = vmul.f32 %v1559_v26, %v2092_v28 }
 0x278   :  { %1570 = vrsqrt.f32 %v535_v9  ;;  %v502_v32 = vpop.xlane.xlu1 %501  ;;  %v504_v8 = vpop.xlane.xlu0 %503 }
 0x279   :  { %v1561_v33 = vpop.eup %1560  ;;  %v536_v34 = vmax.f32 %v502_v32, 1e-24  ;;  %1359 = vmatmul.mubr.f32.gmra.mrb[20].mxu1 %v592_v29  ;;  %v537_v20 = vmax.f32 %v504_v8, 1e-24 }
 0x27a   :  { %v1563_v39 = vpop.eup %1562  ;;  %1361 = vmatprep.mubr.f32.mxu1 %v593_v30  ;;  %v594_v31 = vmul.f32 %v1561_v33, %v2089_v27 }
 0x27b   :  { %1572 = vrsqrt.f32 %v536_v34  ;;  %v595_v40 = vmul.f32 %v1563_v39, %v2102_v38 }
 0x27c   :  { %1574 = vrsqrt.f32 %v537_v20  ;;  %v506_v41 = vpop.xlane.xlu1 %505 }
 0x27d   :  { %v1565_v17 = vpop.eup %1564  ;;  %v538_v36 = vmax.f32 %v506_v41, 1e-24  ;;  %1362 = vmatmul.mubr.f32.gmra.mrb[22].mxu1 %v594_v31 }
 0x27e   :  { %v1567_v28 = vpop.eup %1566  ;;  %1364 = vmatprep.mubr.f32.mxu1 %v595_v40  ;;  %v596_v42 = vmul.f32 %v1565_v17, %v2099_v35 }
 0x27f   :  { %1576 = vrsqrt.f32 %v538_v36  ;;  %v597_v47 = vmul.f32 %v1567_v28, %v2112_v44 }
 0x281   :  { %v1569_v48 = vpop.eup %1568  ;;  %1365 = vmatmul.mubr.f32.gmra.mrb[24].mxu1 %v596_v42 }
 0x282   :  { %v1571_v49 = vpop.eup %1570  ;;  %1367 = vmatprep.mubr.f32.mxu1 %v597_v47  ;;  %v598_v27 = vmul.f32 %v1569_v48, %v2109_v43  ;;  %v1800_v43 = vmov 0.0  }
 0x283   :  { %v599_v38 = vmul.f32 %v1571_v49, %v2122_v54  ;;  %1408 = vmatprep.mubr.msk.f32.mxu0 %vm1799_vm0, %v1800_v43 }
 0x285   :  { %v1573_v37 = vpop.eup %1572  ;;  %1368 = vmatmul.mubr.f32.gmra.mrb[26].mxu1 %v598_v27 }
 0x286   :  { %v1575_v50 = vpop.eup %1574  ;;  %1370 = vmatprep.mubr.f32.mxu1 %v599_v38  ;;  %v600_v55 = vmul.f32 %v1573_v37, %v2119_v53 }
 0x287   :  { %v601_v45 = vmul.f32 %v1575_v50, %v2132_v62 }
 0x289   :  { %v1577_v35 = vpop.eup %1576  ;;  %1371 = vmatmul.mubr.f32.gmra.mrb[28].mxu1 %v600_v55 }
 0x28a   :  { %1373 = vmatprep.mubr.f32.mxu1 %v601_v45  ;;  %v602_v44 = vmul.f32 %v1577_v35, %v2129_v58  ;;  %v852_v58 = vmul.f32 %v851_v0, %v851_v0 }
 0x28c   :  { %v2178_v6 = vrot.slane %v852_v58, %v943_v18 }
 0x28d   :  { %1374 = vmatmul.mubr.f32.gmra.mrb[30].mxu1 %v602_v44 }
 0x324   :  { %v1330_v54 = vpop.f32.mrb[0].mxu1 }
 0x325   :  { %v692_v57 = vpop.f32.mrb[1].mxu1  ;;  %v698_v5 = vadd.f32 %v1330_v54, %v2173_v1 }
 0x326   :  { %v693_v10 = vadd.f32 %v2173_v1, %v692_v57 }
 0x327   :  { %v861_v11 = vmul.f32 %v2176_v14, %v698_v5  ;;  %v947_v61 = vmul.f32 %v2178_v6, %v698_v5 }
 0x328   :  { %v1333_v13 = vpop.f32.mrb[2].mxu1  ;;  %v860_v2 = vmul.f32 %v2176_v14, %v693_v10  ;;  %v946_v16 = vmul.f32 %v2178_v6, %v693_v10 }
 0x329   :  { %v702_v46 = vpop.f32.mrb[3].mxu1  ;;  %v708_v7 = vadd.f32 %v1333_v13, %v2173_v1  ;;  %v2190_v3 = vmul.f32 %v861_v11, %v698_v5  ;;  %v963_v9 = vmul.f32 2.0, %v947_v61 }
 0x32a   :  { %v703_v12 = vadd.f32 %v2173_v1, %v702_v46  ;;  %v2198_v8 = vmul.f32 %v860_v2, %v693_v10  ;;  %v962_v39 = vmul.f32 2.0, %v946_v16 }
 0x32b   :  { %v863_v21 = vmul.f32 %v2176_v14, %v708_v7  ;;  %v949_v26 = vmul.f32 %v2178_v6, %v708_v7 }
 0x32c   :  { %v1336_v53 = vpop.f32.mrb[4].mxu1  ;;  %v862_v29 = vmul.f32 %v2176_v14, %v703_v12  ;;  %v948_v33 = vmul.f32 %v2178_v6, %v703_v12 }
 0x32d   :  { %v712_v62 = vpop.f32.mrb[5].mxu1  ;;  %v718_v24 = vadd.f32 %v1336_v53, %v2173_v1  ;;  %v2203_v31 = vmul.f32 %v863_v21, %v708_v7  ;;  %v965_v48 = vmul.f32 2.0, %v949_v26 }
 0x32e   :  { %v713_v22 = vadd.f32 %v2173_v1, %v712_v62  ;;  %v2213_v49 = vmul.f32 %v862_v29, %v703_v12  ;;  %v964_v50 = vmul.f32 2.0, %v948_v33 }
 0x32f   :  { %v865_v34 = vmul.f32 %v2176_v14, %v718_v24  ;;  %v951_v40 = vmul.f32 %v2178_v6, %v718_v24 }
 0x330   :  { %v1339_v51 = vpop.f32.mrb[6].mxu1  ;;  %v864_v41 = vmul.f32 %v2176_v14, %v713_v22  ;;  %v950_v17 = vmul.f32 %v2178_v6, %v713_v22 }
 0x331   :  { %v722_v4 = vpop.f32.mrb[7].mxu1  ;;  %v728_v23 = vadd.f32 %v1339_v51, %v2173_v1  ;;  %v2219_v55 = vmul.f32 %v865_v34, %v718_v24  ;;  %v967_v44 = vmul.f32 2.0, %v951_v40 }
 0x332   :  { %v723_v30 = vadd.f32 %v2173_v1, %v722_v4  ;;  %v2223_v43 = vmul.f32 %v864_v41, %v713_v22  ;;  %v966_v13 = vmul.f32 2.0, %v950_v17 }
 0x333   :  { %v867_v36 = vmul.f32 %v2176_v14, %v728_v23  ;;  %v953_v28 = vmul.f32 %v2178_v6, %v728_v23 }
 0x334   :  { %v1342_v52 = vpop.f32.mrb[8].mxu1  ;;  %v866_v27 = vmul.f32 %v2176_v14, %v723_v30  ;;  %v952_v45 = vmul.f32 %v2178_v6, %v723_v30 }
 0x335   :  { %v732_v59 = vpop.f32.mrb[9].mxu1  ;;  %v738_v20 = vadd.f32 %v1342_v52, %v2173_v1  ;;  %v2227_v60 = vmul.f32 %v867_v36, %v728_v23  ;;  %v2229_v46 = vmul.f32 2.0, %v953_v28 }
 0x336   :  { %v733_v42 = vadd.f32 %v2173_v1, %v732_v59  ;;  %v2232_v62 = vmul.f32 %v866_v27, %v723_v30  ;;  %v2237_v4 = vmul.f32 2.0, %v952_v45 }
 0x337   :  { %v869_v35 = vmul.f32 %v2176_v14, %v738_v20  ;;  %v955_v54 = vmul.f32 %v2178_v6, %v738_v20 }
 0x338   :  { %v1345_v19 = vpop.f32.mrb[10].mxu1  ;;  %v868_v53 = vmul.f32 %v2176_v14, %v733_v42  ;;  %v954_v0 = vmul.f32 %v2178_v6, %v733_v42 }
 0x339   :  { %v742_v15 = vpop.f32.mrb[11].mxu1  ;;  %v748_v38 = vadd.f32 %v1345_v19, %v2173_v1  ;;  %v2239_v5 = vmul.f32 %v869_v35, %v738_v20  ;;  %v2243_v10 = vmul.f32 2.0, %v955_v54 }
 0x33a   :  { %v743_v57 = vadd.f32 %v2173_v1, %v742_v15  ;;  %v2247_v61 = vmul.f32 %v868_v53, %v733_v42  ;;  %v2251_v16 = vmul.f32 2.0, %v954_v0 }
 0x33b   :  { %v871_v51 = vmul.f32 %v2176_v14, %v748_v38  ;;  %v957_v52 = vmul.f32 %v2178_v6, %v748_v38 }
 0x33c   :  { %v1348_v25 = vpop.f32.mrb[12].mxu1  ;;  %v870_v7 = vmul.f32 %v2176_v14, %v743_v57  ;;  %v956_v12 = vmul.f32 %v2178_v6, %v743_v57 }
 0x33d   :  { %v2196_v32 = vpop.f32.mrb[13].mxu1  ;;  %v2253_v21 = vmul.f32 %v871_v51, %v748_v38  ;;  %v2256_v29 = vmul.f32 2.0, %v957_v52 }
 0x33e   :  { %v2260_v34 = vmul.f32 %v870_v7, %v743_v57  ;;  %v2264_v41 = vmul.f32 2.0, %v956_v12 }
 0x340   :  { %v2211_v47 = vpop.f32.mrb[14].mxu1 }
 0x341   :  { %v2217_v37 = vpop.f32.mrb[15].mxu1 }
 0x344   :  { %v1354_v63 = vpop.f32.mrb[16].mxu1 }
 0x345   :  { %v778_v58 = vadd.f32 %v1354_v63, %v2173_v1  ;;  %v772_v18 = vpop.f32.mrb[17].mxu1 }
 0x346   :  { %v773_v59 = vadd.f32 %v2173_v1, %v772_v18 }
 0x347   :  { %v893_v11 = vmul.f32 %v2176_v14, %v778_v58  ;;  %v979_v19 = vmul.f32 %v963_v9, %v778_v58  ;;  %v758_v9 = vadd.f32 %v1348_v25, %v2173_v1  ;;  %v753_v25 = vadd.f32 %v2173_v1, %v2196_v32 }
 0x348   :  { %v892_v15 = vmul.f32 %v2176_v14, %v773_v59  ;;  %v978_v2 = vmul.f32 %v962_v39, %v773_v59  ;;  %v1357_v24 = vpop.f32.mrb[18].mxu1 }
 0x349   :  { %v909_v22 = vmul.f32 %v893_v11, %v778_v58  ;;  %v788_v23 = vadd.f32 %v1357_v24, %v2173_v1  ;;  %v782_v26 = vpop.f32.mrb[19].mxu1  ;;  %v872_v52 = vmul.f32 %v2176_v14, %v753_v25  ;;  %v958_v12 = vmul.f32 %v2178_v6, %v753_v25 }
 0x34a   :  { %v908_v30 = vmul.f32 %v892_v15, %v773_v59  ;;  %v783_v33 = vadd.f32 %v2173_v1, %v782_v26 }
 0x34b   :  { %v925_v20 = vadd.f32 %v909_v22, %v2190_v3  ;;  %v895_v39 = vmul.f32 %v2176_v14, %v788_v23  ;;  %v981_v40 = vmul.f32 %v965_v48, %v788_v23  ;;  %v873_v3 = vmul.f32 %v2176_v14, %v758_v9 }
 0x34c   :  { %v924_v17 = vadd.f32 %v908_v30, %v2198_v8  ;;  %v894_v36 = vmul.f32 %v2176_v14, %v783_v33  ;;  %v980_v28 = vmul.f32 %v964_v50, %v783_v33  ;;  %v1360_v42 = vpop.f32.mrb[20].mxu1  ;;  %v959_v8 = vmul.f32 %v2178_v6, %v758_v9 }
 0x34d   :  { %v995_v27 = vadd.f32 %v979_v19, %v925_v20  ;;  %v911_v38 = vmul.f32 %v895_v39, %v788_v23  ;;  %v798_v45 = vadd.f32 %v1360_v42, %v2173_v1  ;;  %v792_v35 = vpop.f32.mrb[21].mxu1 }
 0x34e   :  { %v994_v54 = vadd.f32 %v978_v2, %v924_v17  ;;  %v910_v48 = vmul.f32 %v894_v36, %v783_v33  ;;  %v793_v57 = vadd.f32 %v2173_v1, %v792_v35  ;;  %v975_v20 = vmul.f32 2.0, %v959_v8 }
 0x34f   :  { %v927_v53 = vadd.f32 %v911_v38, %v2203_v31  ;;  %v897_v50 = vmul.f32 %v2176_v14, %v798_v45  ;;  %v983_v63 = vmul.f32 %v967_v44, %v798_v45  ;;  %v763_v8 = vadd.f32 %v2173_v1, %v2217_v37 }
 0x350   :  { %v926_v32 = vadd.f32 %v910_v48, %v2213_v49  ;;  %v896_v0 = vmul.f32 %v2176_v14, %v793_v57  ;;  %v982_v51 = vmul.f32 %v966_v13, %v793_v57  ;;  %v1363_v58 = vpop.f32.mrb[22].mxu1  ;;  %v1476_v18 = vpack.c.bf16 %v995_v27, %v994_v54 }
 0x351   :  { %v997_v59 = vadd.f32 %v981_v40, %v927_v53  ;;  %v913_v7 = vmul.f32 %v897_v50, %v798_v45  ;;  %v808_v11 = vadd.f32 %v1363_v58, %v2173_v1  ;;  %v802_v19 = vpop.f32.mrb[23].mxu1  ;;  %v2282_v49 = vmul.f32 %v873_v3, %v758_v9 }
 0x352   :  { %v996_v31 = vadd.f32 %v980_v28, %v926_v32  ;;  %v912_v15 = vmul.f32 %v896_v0, %v793_v57  ;;  %v803_v44 = vadd.f32 %v2173_v1, %v802_v19  ;;  %1477 = vmatpush3.bf16.xpose.msra.mxu0 %v1476_v18  ;;  %v888_v28 = vmul.f32 %v872_v52, %v753_v25 }
 0x353   :  { %v929_v13 = vadd.f32 %v913_v7, %v2219_v55  ;;  %v899_v2 = vmul.f32 %v2176_v14, %v808_v11  ;;  %v985_v24 = vmul.f32 %v2229_v46, %v808_v11  ;;  %1478 = vmatprep.subr.bf16.mxu0 %v1798_v56  ;;  %v2296_v46 = vadd.f32 %v2211_v47, %v2173_v1 }
 0x354   :  { %v928_v22 = vadd.f32 %v912_v15, %v2223_v43  ;;  %v898_v23 = vmul.f32 %v2176_v14, %v803_v44  ;;  %v984_v26 = vmul.f32 %v2237_v4, %v803_v44  ;;  %v1366_v30 = vpop.f32.mrb[24].mxu1  ;;  %v1479_v33 = vpack.c.bf16 %v997_v59, %v996_v31 }
 0x355   :  { %v2291_v39 = vadd.f32 %v983_v63, %v929_v13  ;;  %v915_v9 = vmul.f32 %v899_v2, %v808_v11  ;;  %v818_v55 = vadd.f32 %v1366_v30, %v2173_v1  ;;  %v812_v40 = vpop.f32.mrb[25].mxu1  ;;  %v974_v54 = vmul.f32 2.0, %v958_v12 }
 0x356   :  { %v998_v17 = vadd.f32 %v982_v51, %v928_v22  ;;  %v914_v36 = vmul.f32 %v898_v23, %v803_v44  ;;  %v813_v43 = vadd.f32 %v2173_v1, %v812_v40  ;;  %v961_v52 = vmul.f32 %v2178_v6, %v2296_v46 }
 0x357   :  { %v931_v4 = vadd.f32 %v915_v9, %v2227_v60  ;;  %v901_v42 = vmul.f32 %v2176_v14, %v818_v55  ;;  %v987_v27 = vmul.f32 %v2243_v10, %v818_v55  ;;  %v874_v31 = vmul.f32 %v2176_v14, %v763_v8 }
 0x358   :  { %v930_v38 = vadd.f32 %v914_v36, %v2232_v62  ;;  %v900_v45 = vmul.f32 %v2176_v14, %v813_v43  ;;  %v986_v35 = vmul.f32 %v2251_v16, %v813_v43  ;;  %v1369_v3 = vpop.f32.mrb[26].mxu1  ;;  %v1482_v47 = vpack.c.bf16 %v2291_v39, %v998_v17 }
 0x359   :  { %v2306_v48 = vadd.f32 %v985_v24, %v931_v4  ;;  %v917_v57 = vmul.f32 %v901_v42, %v818_v55  ;;  %v828_v25 = vadd.f32 %v1369_v3, %v2173_v1  ;;  %v822_v60 = vpop.f32.mrb[27].mxu1  ;;  %v875_v16 = vmul.f32 %v2176_v14, %v2296_v46 }
 0x35a   :  { %v1000_v10 = vadd.f32 %v984_v26, %v930_v38  ;;  %v916_v53 = vmul.f32 %v900_v45, %v813_v43  ;;  %v823_v62 = vadd.f32 %v2173_v1, %v822_v60  ;;  %1480 = vmatpush3.bf16.xpose.msra.mxu0 %v1479_v33  ;;  %v977_v26 = vmul.f32 2.0, %v961_v52 }
 0x35b   :  { %v933_v50 = vadd.f32 %v917_v57, %v2239_v5  ;;  %v903_v63 = vmul.f32 %v2176_v14, %v828_v25  ;;  %v989_v32 = vmul.f32 %v2256_v29, %v828_v25  ;;  %1481 = vmatprep.subr.bf16.mxu0 %v1798_v56  ;;  %v960_v29 = vmul.f32 %v2178_v6, %v763_v8 }
 0x35c   :  { %v932_v0 = vadd.f32 %v916_v53, %v2247_v61  ;;  %v902_v37 = vmul.f32 %v2176_v14, %v823_v62  ;;  %v988_v51 = vmul.f32 %v2264_v41, %v823_v62  ;;  %v1372_v58 = vpop.f32.mrb[28].mxu1  ;;  %v1485_v18 = vpack.c.bf16 %v2306_v48, %v1000_v10 }
 0x35d   :  { %v1003_v59 = vadd.f32 %v987_v27, %v933_v50  ;;  %v919_v5 = vmul.f32 %v903_v63, %v828_v25  ;;  %v838_v7 = vadd.f32 %v1372_v58, %v2173_v1  ;;  %v832_v11 = vpop.f32.mrb[29].mxu1  ;;  %v976_v9 = vmul.f32 2.0, %v960_v29 }
 0x35e   :  { %v1002_v19 = vadd.f32 %v986_v35, %v932_v0  ;;  %v918_v12 = vmul.f32 %v902_v37, %v823_v62  ;;  %v833_v61 = vadd.f32 %v2173_v1, %v832_v11  ;;  %v891_v27 = vmul.f32 %v875_v16, %v2296_v46 }
 0x35f   :  { %v935_v41 = vadd.f32 %v919_v5, %v2253_v21  ;;  %v905_v15 = vmul.f32 %v2176_v14, %v838_v7  ;;  %v991_v44 = vmul.f32 %v975_v20, %v838_v7  ;;  %v890_v35 = vmul.f32 %v874_v31, %v763_v8 }
 0x360   :  { %v934_v13 = vadd.f32 %v918_v12, %v2260_v34  ;;  %v904_v2 = vmul.f32 %v2176_v14, %v833_v61  ;;  %v990_v24 = vmul.f32 %v974_v54, %v833_v61  ;;  %v1375_v22 = vpop.f32.mrb[30].mxu1  ;;  %v1488_v23 = vpack.c.bf16 %v1003_v59, %v1002_v19 }
 0x361   :  { %v1005_v6 = vadd.f32 %v989_v32, %v935_v41  ;;  %v921_v30 = vmul.f32 %v905_v15, %v838_v7  ;;  %v848_v33 = vadd.f32 %v1375_v22, %v2173_v1  ;;  %v842_v39 = vpop.f32.mrb[31].mxu1 }
 0x362   :  { %v1004_v55 = vadd.f32 %v988_v51, %v934_v13  ;;  %v920_v40 = vmul.f32 %v904_v2, %v833_v61  ;;  %v843_v21 = vadd.f32 %v2173_v1, %v842_v39  ;;  %1483 = vmatpush3.bf16.xpose.msra.mxu0 %v1482_v47 }
 0x363   :  { %v937_v20 = vadd.f32 %v921_v30, %v2282_v49  ;;  %v907_v34 = vmul.f32 %v2176_v14, %v848_v33  ;;  %v993_v17 = vmul.f32 %v977_v26, %v848_v33  ;;  %1484 = vmatprep.subr.bf16.mxu0 %v1798_v56 }
 0x364   :  { %v936_v36 = vadd.f32 %v920_v40, %v888_v28  ;;  %v906_v43 = vmul.f32 %v2176_v14, %v843_v21  ;;  %v992_v4 = vmul.f32 %v976_v9, %v843_v21  ;;  %v1491_v42 = vpack.c.bf16 %v1005_v6, %v1004_v55 }
 0x365   :  { %v1007_v38 = vadd.f32 %v991_v44, %v937_v20  ;;  %v923_v45 = vmul.f32 %v907_v34, %v848_v33  ;;  %v1801_v14 = vmov 1.0  }
 0x366   :  { %v1006_v3 = vadd.f32 %v990_v24, %v936_v36  ;;  %v922_v1 = vmul.f32 %v906_v43, %v843_v21 }
 0x367   :  { %v939_v47 = vadd.f32 %v923_v45, %v891_v27 }
 0x368   :  { %v938_v54 = vadd.f32 %v922_v1, %v890_v35  ;;  %v1494_v49 = vpack.c.bf16 %v1007_v38, %v1006_v3 }
 0x369   :  { %v1009_v48 = vadd.f32 %v993_v17, %v939_v47 }
 0x36a   :  { %v1008_v57 = vadd.f32 %v992_v4, %v938_v54  ;;  %1486 = vmatpush3.bf16.xpose.msra.mxu0 %v1485_v18 }
 0x36b   :  { %1487 = vmatprep.subr.bf16.mxu0 %v1798_v56 }
 0x36c   :  { %v1497_v28 = vpack.c.bf16 %v1009_v48, %v1008_v57 }
 0x372   :  { %1489 = vmatpush3.bf16.xpose.msra.mxu0 %v1488_v23 }
 0x373   :  { %1490 = vmatprep.subr.bf16.mxu0 %v1798_v56 }
 0x37a   :  { %1492 = vmatpush3.bf16.xpose.msra.mxu0 %v1491_v42 }
 0x37b   :  { %1493 = vmatprep.subr.bf16.mxu0 %v1798_v56 }
 0x382   :  { %1495 = vmatpush3.bf16.xpose.msra.mxu0 %v1494_v49 }
 0x383   :  { %1496 = vmatprep.subr.bf16.mxu0 %v1798_v56 }
 0x38a   :  { %1498 = vmatpush3.bf16.xpose.msra.mxu0 %v1497_v28 }
 0x391   :  { %1409 = vmatmul.mubr.f32.vlgmr.msra.gmra.mrb[32].mxu0 %v1801_v14 }
 0x464   :  { %v1076_v46 = vpop.f32.mrb[32].mxu0 }
 0x465   :  { %1080 = vst [vmem:[#allocation16] sm:$0x1] %v1076_v46  ;;  %v1410_v25 = vpop.f32.mrb[33].mxu0 }
 0x466   :  { %1765 = shalt.err (!%p1762_p12)
}
 0x467   :  { %s1766_s14 = scalar_lea.hbm %s2363_s8, 16 }
 0x468   :  { %p1767_p13 = scmp.ne.s32.totalorder %s2363_s8, %s1766_s14  ;;  %p1770_p0 = scmp.lt.u32.totalorder %s1766_s14, %s2363_s8 }
 0x46a   :  { %p1772_p1 = pnand %p1770_p0, %p1767_p13 }
 0x46c   :  { %1775 = shalt.err (!%p1772_p1)
}
 0x46d   :  { %1090 = dma.vmem_to_hbm [thread:$0]  %s1088_s10, 16, %s2363_s8, [#allocation4]  }
 0x46e   :  { %1786 = dma.done.wait [#allocation4], 16  }
 0x46f   :  { %1787 = vsyncadd [#allocation4], 4294967280 }
 0x470   :  { %1094 = vsyncpa [#allocation3], 1 }
 0x471   :  { %1095 = vsyncpa [#allocation6], 1 }
 0x472   :  { %1096 = vsyncpa [#allocation9], 1 }
 0x473   :  { %1097 = vsyncpa [#allocation12], 1 }
 0x474   :  { %1098 = vsyncpa [#allocation15], 1 }
 0x475   :  { %1099 = vsyncpa [#allocation4], 1 }

</bundles_post_ra>
